<compile_context>
chip_gen: v6e
topology: v6e:2x2x1
jax: 0.10.0
libtpu: 0.0.40
codegen_flags: <defaults>
</compile_context>

<pallas_src>
import jax
import jax.numpy as jnp
import numpy as np
from jax.experimental import pallas as pl
from jax.experimental.pallas import tpu as pltpu


LANE = 128      # vreg lane width — last dim of every tile
SUBLANE = 8     # f32 sublane count — row-tile alignment


def _copy_kernel(x_ref, o_ref):
    # Pure pass-through; the reference forward has no arithmetic to fuse.
    o_ref[...] = x_ref[...]


def _tile_byte_budget():
    """Per-tile byte budget, generation-aware.

    Keeps 2 arrays x 2 pipeline buffers x tile well inside scoped VMEM on
    v5e (128 MiB phys), v6e (128 MiB phys) and v7x (64 MiB phys).
    """
    try:
        vmem = pltpu.get_tpu_info().vmem_capacity_bytes
    except Exception:  # pragma: no cover - conservative fallback off-TPU
        vmem = 64 << 20
    # 4 live tile buffers (in/out, double-buffered); stay under ~1/4 of VMEM.
    return min(4 << 20, max(512 << 10, vmem // 16))


def transformer_decoder_forward(x):
    """Pallas equivalent of TransformerDecoder.forward.

    The PyTorch forward is `pass` (no computation); this is the identity
    pass-through of `x`, implemented as a lane-dense, row-tiled, pipelined
    copy kernel.
    """
    orig_shape = x.shape
    n = x.size
    itemsize = jnp.dtype(x.dtype).itemsize

    # ---- Lane-dense slab: flatten, pad tail up to a multiple of 8*128 ------
    flat = x.reshape(-1)
    pad = (-n) % (LANE * SUBLANE)
    if pad:
        # Sub-(8,128) tails would force masked partial stores; padding keeps
        # every store a full-width unmasked vst.  Pad is < 1024 elements.
        flat = jnp.pad(flat, (0, pad))
    rows = flat.size // LANE          # always a multiple of SUBLANE
    x2d = flat.reshape(rows, LANE)

    # ---- Tile sizing --------------------------------------------------------
    budget = _tile_byte_budget()
    max_tile_rows = max(SUBLANE, (budget // (LANE * itemsize)) // SUBLANE * SUBLANE)

    if rows <= 2 * SUBLANE:
        # Too small to split into two aligned tiles: single full-extent block.
        tile_rows = rows
    else:
        # At least 2 grid steps so v7x's second TensorCore gets work, but no
        # larger than the per-generation VMEM budget.
        half = -(-rows // 2)                                  # cdiv(rows, 2)
        half = -(-half // SUBLANE) * SUBLANE                  # round up to 8
        tile_rows = min(max_tile_rows, half)

    grid = (pl.cdiv(rows, tile_rows),)

    tile_bytes = tile_rows * LANE * itemsize
    # 2 arrays x 2 pipeline buffers per tile, plus headroom; clamp to a range
    # that is legal on all of v5e / v6e / v7x.
    vmem_limit = int(min(32 << 20, max(16 << 20, 4 * tile_bytes + (4 << 20))))

    out2d = pl.pallas_call(
        _copy_kernel,
        out_shape=jax.ShapeDtypeStruct((rows, LANE), x2d.dtype),
        grid=grid,
        in_specs=[pl.BlockSpec((tile_rows, LANE), lambda i: (i, 0))],
        out_specs=pl.BlockSpec((tile_rows, LANE), lambda i: (i, 0)),
        compiler_params=pltpu.CompilerParams(
            # Row-tile axis is embarrassingly parallel: lets v7x shard copy
            # tiles across both TensorCores; neutral on v5e/v6e.
            dimension_semantics=("parallel",),
            vmem_limit_bytes=vmem_limit,
        ),
    )(x2d)

    out_flat = out2d.reshape(-1)
    if pad:
        out_flat = out_flat[:n]
    return out_flat.reshape(orig_shape)


if __name__ == "__main__":
    key = jax.random.PRNGKey(0)
    # Small NCHW-style shape consistent with the module's (unspecified) input.
    x = jax.random.normal(key, (2, 4, 16, 16), dtype=jnp.float32)

    # Host-side reference snapshot of the expected pass-through result.
    x_expected = np.asarray(x)

    y = transformer_decoder_forward(x)
    jax.block_until_ready(y)

    # Sanity check: pass-through semantics.
    assert y.shape == x_expected.shape and y.dtype == x.dtype
    assert bool(jnp.allclose(y, jnp.asarray(x_expected)))

    print("KERNEL_OK")
</pallas_src>

<mosaic_0001>
module attributes {stable_mosaic.version = 11 : i64} {
  func.func @_copy_kernel(%arg0: i32, %arg1: memref<16x128xf32, #tpu.memory_space<vmem>>, %arg2: memref<16x128xf32, #tpu.memory_space<vmem>>) attributes {dimension_semantics = [#tpu.dimension_semantics<parallel>], iteration_bounds = array<i64: 1>, scalar_prefetch = 0 : i64, scratch_operands = 0 : i64, tpu.core_type = #tpu.core_type<tc>, window_params = [{transform_indices = @transform_0, window_bounds = array<i64: 16, 128>}, {transform_indices = @transform_1, window_bounds = array<i64: 16, 128>}]} {
    %c0 = arith.constant 0 : index
    %c0_0 = arith.constant 0 : index
    %0 = vector.load %arg1[%c0, %c0_0] : memref<16x128xf32, #tpu.memory_space<vmem>>, vector<16x128xf32>
    %c0_1 = arith.constant 0 : index
    %c0_2 = arith.constant 0 : index
    %1 = vector.load %arg2[%c0_1, %c0_2] : memref<16x128xf32, #tpu.memory_space<vmem>>, vector<16x128xf32>
    tpu.vector_store %arg2[%c0_1, %c0_2], %0 {strides = array<i32>} : memref<16x128xf32, #tpu.memory_space<vmem>>, vector<16x128xf32>,
    return
  }
  func.func @transform_0(%arg0: i32) -> (i32, i32) {
    %c0_i32 = arith.constant 0 : i32
    %c0_i32_0 = arith.constant 0 : i32
    return %arg0, %c0_i32 : i32, i32
  }
  func.func @transform_1(%arg0: i32) -> (i32, i32) {
    %c0_i32 = arith.constant 0 : i32
    %c0_i32_0 = arith.constant 0 : i32
    return %arg0, %c0_i32 : i32, i32
  }
}

</mosaic_0001>

<bundles_post_ra>
// kernel: tpu_custom_call.1
= control target key start
LH: loop header
LB: loop body
LE: loop exit
PB: predicated region body
PF: predicated region fallthrough
CT: control target
= control target key end

     0   :  { %6 = vsyncpa [#allocation3], 0  ;;  %s112_s0 = inlined_call_operand.hbm [shape: f32[16,128], index: 0, kind: input, shape index: {}]   ;;  %s113_s1 = inlined_call_operand.hbm [shape: f32[16,128], index: 1, kind: output, shape index: {}]  }
   0x1   :  { %7 = vsyncpa [#allocation4], 0  ;;  %s92_s6 = smov [#allocation2]  }
   0x2   :  { %s13_s7 = sshll.u32 %s92_s6, 4  ;;  %s14_s7 = int_to_ptr.vmem [resolvable:$true] %s13_s7 }
   0x3   :  { %s56_s8 = scalar_lea.vmem %s14_s7, 256  ;;  %p61_p1 = scmp.lt.s32.totalorder %s14_s7, %s14_s7 }
   0x4   :  { %p57_p0 = scmp.ne.s32.totalorder %s14_s7, %s56_s8  ;;  %p62_p2 = scmp.lt.s32.totalorder %s56_s8, %s56_s8 }
   0x6   :  { %p63_p3 = por %p62_p2, %p61_p1 }
   0x8   :  { %p64_p4 = pnand %p63_p3, %p57_p0 }
   0xa   :  { %67 = shalt.err (!%p64_p4)
}
   0xb   :  { %s93_s9 = smov 128   ;;  %s94_s10 = smov 8  }
   0xc   :  { %19 = dma.hbm_to_vmem [thread:$0]  %s112_s0, 256, %s14_s7, [#allocation3], %s93_s9, %s93_s9, %s94_s10  }
   0xd   :  { %88 = dma.done.wait [#allocation3], 256  }
   0xe   :  { %89 = vsyncadd [#allocation3], 4294967040  ;;  %s95_s13 = smov [#allocation5]   ;;  %v23_v0 = vld [vmem:[#allocation2] sm:$0xff]  ;;  %v24_v1 = vld [vmem:[#allocation2 + $0x8] sm:$0xff] }
   0xf   :  { %s32_s14 = sshll.u32 %s95_s13, 4  ;;  %25 = vst [vmem:[#allocation5] sm:$0xff] %v23_v0  ;;  %26 = vst [vmem:[#allocation5 + $0x8] sm:$0xff] %v24_v1  ;;  %s33_s14 = int_to_ptr.vmem [resolvable:$true] %s32_s14 }
  0x10   :  { %s68_s15 = scalar_lea.vmem %s33_s14, 256  ;;  %p73_p6 = scmp.lt.s32.totalorder %s33_s14, %s33_s14 }
  0x11   :  { %p69_p5 = scmp.ne.s32.totalorder %s33_s14, %s68_s15  ;;  %p74_p7 = scmp.lt.s32.totalorder %s68_s15, %s68_s15 }
  0x13   :  { %p75_p8 = por %p74_p7, %p73_p6 }
  0x15   :  { %p76_p9 = pnand %p75_p8, %p69_p5 }
  0x17   :  { %79 = shalt.err (!%p76_p9)
}
  0x18   :  { %38 = dma.vmem_to_hbm [thread:$0]  %s33_s14, 256, %s113_s1, [#allocation4], %s93_s9, %s93_s9, %s94_s10  }
  0x19   :  { %90 = dma.done.wait [#allocation4], 256  }
  0x1a   :  { %91 = vsyncadd [#allocation4], 4294967040 }
  0x1b   :  { %42 = vsyncpa [#allocation3], 1 }
  0x1c   :  { %43 = vsyncpa [#allocation4], 1 }

</bundles_post_ra>
